<compile_context>
chip_gen: v7x
topology: tpu7x:2x2x1
jax: 0.10.0
libtpu: 0.0.40
codegen_flags: <defaults>
</compile_context>

<pallas_src>
import jax
import jax.numpy as jnp
from jax.experimental import pallas as pl
from jax.experimental.pallas import tpu as pltpu

IN_FEATURES = 3
OUT_FEATURES = 1


def _linear_kernel(wb_ref, xt_ref, o_ref):
    # wb_ref: (IN+1,) f32 in SMEM -> [w0, w1, w2, b]
    # xt_ref: (IN, TB) in VMEM (feature-major: batch on the 128-lane axis)
    # o_ref : (1, TB)  in VMEM (lane-dense output row)
    x = xt_ref[...].astype(jnp.float32)            # (IN, TB), f32 accumulate
    acc = wb_ref[0] * x[0:1, :]
    for k in range(1, IN_FEATURES):                # static unroll: 3 VPU FMAs/vreg
        acc = acc + wb_ref[k] * x[k:k + 1, :]
    acc = acc + wb_ref[IN_FEATURES]                # bias (scalar broadcast)
    o_ref[...] = acc.astype(o_ref.dtype)


def _ceil_div(a, b):
    return (a + b - 1) // b


def _round_up(n, m):
    return _ceil_div(n, m) * m


def linear_forward_feature_major(xt, weight, bias, *, block_b=131072):
    """Pallas path.  xt: (IN, B) feature-major; weight: (1, IN); bias: (1,).

    Returns (1, B) with the same dtype as xt.
    """
    in_f, B = xt.shape
    out_f, in_f_w = weight.shape
    assert in_f == in_f_w == IN_FEATURES
    assert out_f == OUT_FEATURES == 1

    # Batch tile: multiple of 128 lanes, big enough to amortize per-step
    # overhead, capped so the grid has >= 2 steps when the batch allows it.
    tb = min(block_b, _round_up(B, 128))
    if B > 256:
        tb = min(tb, _round_up(_ceil_div(B, 2), 128))
    tb = max(128, _round_up(tb, 128))
    grid = (_ceil_div(B, tb),)

    # [w0, w1, w2, b] -> SMEM (no padded VMEM parameter tiles / per-step DMAs).
    wb = jnp.concatenate(
        [weight.reshape(-1), bias.reshape(-1)]).astype(jnp.float32)

    # Double-buffered (3,tb) input (8-sublane padded) + (1,tb) output + headroom.
    itemsize = max(jnp.dtype(xt.dtype).itemsize, 4)
    vmem_bytes = 2 * (8 * tb * itemsize) * 2 + (2 << 20)
    vmem_bytes = int(min(max(vmem_bytes, 16 << 20), 48 << 20))

    cost = pl.CostEstimate(flops=7 * B, transcendentals=0, bytes_accessed=16 * B)

    yt = pl.pallas_call(
        _linear_kernel,
        out_shape=jax.ShapeDtypeStruct((OUT_FEATURES, B), xt.dtype),
        grid_spec=pltpu.PrefetchScalarGridSpec(
            num_scalar_prefetch=0,
            grid=grid,
            in_specs=[
                # 4 scalar parameters -> SMEM
                pl.BlockSpec(memory_space=pltpu.MemorySpace.SMEM),
                # (IN, tb) tile: IN equals the full dim, tb is 128-aligned;
                # ragged last block is masked by Pallas on writeback.
                pl.BlockSpec((IN_FEATURES, tb), lambda i: (0, i)),
            ],
            out_specs=pl.BlockSpec((OUT_FEATURES, tb), lambda i: (0, i)),
        ),
        compiler_params=pltpu.CompilerParams(
            dimension_semantics=("parallel",),     # megacore on v7x
            vmem_limit_bytes=vmem_bytes),
        cost_estimate=cost,
    )(wb, xt)
    return yt


def linear_forward(x, weight, bias):
    """Row-major PyTorch-layout path: x (B, IN) -> (B, OUT).

    For (B, 3) row-major inputs a fused XLA matmul is one read + one write,
    i.e. already at the HBM roofline; relayouting into the feature-major form
    the Pallas kernel wants would cost more HBM traffic than it saves, so this
    path intentionally stays in XLA (the Pallas path is
    `linear_forward_feature_major` for producers that can emit (IN, B)).
    """
    return x @ weight.T + bias


if __name__ == "__main__":
    key = jax.random.PRNGKey(0)
    kx, kw, kb = jax.random.split(key, 3)

    # Deterministic init (mimics nn.Linear's uniform(-1/sqrt(in), 1/sqrt(in)))
    bound = 1.0 / (IN_FEATURES ** 0.5)
    weight = jax.random.uniform(kw, (OUT_FEATURES, IN_FEATURES),
                                minval=-bound, maxval=bound, dtype=jnp.float32)
    bias = jax.random.uniform(kb, (OUT_FEATURES,),
                              minval=-bound, maxval=bound, dtype=jnp.float32)

    # ---- Pallas path: feature-major (IN, B), no wrapper pad/transpose ----
    B = 1024    # small shape; tile capping yields a 2-step "parallel" grid
    xt = jax.random.normal(kx, (IN_FEATURES, B), dtype=jnp.float32)
    yt = jax.block_until_ready(linear_forward_feature_major(xt, weight, bias))
    yt_ref = weight @ xt + bias[:, None]
    assert yt.shape == (OUT_FEATURES, B)
    assert jnp.allclose(yt, yt_ref, atol=1e-5, rtol=1e-5)

    # Ragged batch (not a tile multiple): last block masked on writeback.
    B2 = 1000
    xt2 = jax.random.normal(kx, (IN_FEATURES, B2), dtype=jnp.float32)
    yt2 = jax.block_until_ready(linear_forward_feature_major(xt2, weight, bias))
    assert yt2.shape == (OUT_FEATURES, B2)
    assert jnp.allclose(yt2, weight @ xt2 + bias[:, None], atol=1e-5, rtol=1e-5)

    # bf16 streaming (f32 accumulate in-kernel) -- halves HBM read traffic.
    xt_bf = xt.astype(jnp.bfloat16)
    yt_bf = jax.block_until_ready(linear_forward_feature_major(xt_bf, weight, bias))
    ref_bf = weight @ xt_bf.astype(jnp.float32) + bias[:, None]
    assert jnp.allclose(yt_bf.astype(jnp.float32), ref_bf, atol=2e-2, rtol=2e-2)

    # ---- PyTorch-layout (B, 3) row-major path: fused XLA is the roofline ----
    xr = jax.random.normal(kx, (8, IN_FEATURES), dtype=jnp.float32)
    yr = jax.block_until_ready(linear_forward(xr, weight, bias))
    assert yr.shape == (8, OUT_FEATURES)
    assert jnp.allclose(yr, xr @ weight.T + bias, atol=1e-5, rtol=1e-5)

    print("KERNEL_OK")
</pallas_src>

<mosaic_0001>
module attributes {stable_mosaic.version = 11 : i64} {
  func.func @_linear_kernel(%arg0: i32, %arg1: memref<4xf32, #tpu.memory_space<smem>>, %arg2: memref<3x512xf32, #tpu.memory_space<vmem>>, %arg3: memref<1x512xf32, #tpu.memory_space<vmem>>) attributes {dimension_semantics = [#tpu.dimension_semantics<parallel>], iteration_bounds = array<i64: 2>, scalar_prefetch = 0 : i64, scratch_operands = 0 : i64, tpu.core_type = #tpu.core_type<tc>, window_params = [{transform_indices = @transform_0, window_bounds = array<i64: 4>}, {transform_indices = @transform_1, window_bounds = array<i64: 3, 512>}, {transform_indices = @transform_2, window_bounds = array<i64: 1, 512>}]} {
    %c0 = arith.constant 0 : index
    %c0_0 = arith.constant 0 : index
    %0 = vector.load %arg2[%c0, %c0_0] : memref<3x512xf32, #tpu.memory_space<vmem>>, vector<3x512xf32>
    %c0_1 = arith.constant 0 : index
    %1 = memref.load %arg1[%c0_1] : memref<4xf32, #tpu.memory_space<smem>>
    %2 = vector.extract_strided_slice %0 {offsets = [0, 0], sizes = [1, 512], strides = [1, 1]} : vector<3x512xf32> to vector<1x512xf32>
    %3 = vector.broadcast %1 : f32 to vector<1x512xf32>
    %4 = arith.mulf %3, %2 : vector<1x512xf32>
    %c1 = arith.constant 1 : index
    %5 = memref.load %arg1[%c1] : memref<4xf32, #tpu.memory_space<smem>>
    %6 = vector.extract_strided_slice %0 {offsets = [1, 0], sizes = [1, 512], strides = [1, 1]} : vector<3x512xf32> to vector<1x512xf32>
    %7 = vector.broadcast %5 : f32 to vector<1x512xf32>
    %8 = arith.mulf %7, %6 : vector<1x512xf32>
    %9 = arith.addf %4, %8 : vector<1x512xf32>
    %c2 = arith.constant 2 : index
    %10 = memref.load %arg1[%c2] : memref<4xf32, #tpu.memory_space<smem>>
    %11 = vector.extract_strided_slice %0 {offsets = [2, 0], sizes = [1, 512], strides = [1, 1]} : vector<3x512xf32> to vector<1x512xf32>
    %12 = vector.broadcast %10 : f32 to vector<1x512xf32>
    %13 = arith.mulf %12, %11 : vector<1x512xf32>
    %14 = arith.addf %9, %13 : vector<1x512xf32>
    %c3 = arith.constant 3 : index
    %15 = memref.load %arg1[%c3] : memref<4xf32, #tpu.memory_space<smem>>
    %16 = vector.broadcast %15 : f32 to vector<1x512xf32>
    %17 = arith.addf %14, %16 : vector<1x512xf32>
    %c0_2 = arith.constant 0 : index
    %c0_3 = arith.constant 0 : index
    %18 = vector.load %arg3[%c0_2, %c0_3] : memref<1x512xf32, #tpu.memory_space<vmem>>, vector<1x512xf32>
    tpu.vector_store %arg3[%c0_2, %c0_3], %17 {strides = array<i32>} : memref<1x512xf32, #tpu.memory_space<vmem>>, vector<1x512xf32>,
    return
  }
  func.func @transform_0(%arg0: i32) -> i32 {
    %c0_i32 = arith.constant 0 : i32
    %c0_i32_0 = arith.constant 0 : i32
    return %c0_i32 : i32
  }
  func.func @transform_1(%arg0: i32) -> (i32, i32) {
    %c0_i32 = arith.constant 0 : i32
    %c0_i32_0 = arith.constant 0 : i32
    return %c0_i32, %arg0 : i32, i32
  }
  func.func @transform_2(%arg0: i32) -> (i32, i32) {
    %c0_i32 = arith.constant 0 : i32
    %c0_i32_0 = arith.constant 0 : i32
    return %c0_i32, %arg0 : i32, i32
  }
}

</mosaic_0001>

<bundles_post_ra>
// kernel: tpu_custom_call.1
= control target key start
LH: loop header
LB: loop body
LE: loop exit
PB: predicated region body
PF: predicated region fallthrough
CT: control target
= control target key end

     0   :  { %7 = vsyncpa [#allocation5], 0  ;;  %s762_s0 = inlined_call_operand.hbm [shape: f32[4], index: 0, kind: input, shape index: {}]   ;;  %s763_s1 = inlined_call_operand.hbm [shape: f32[3,1024], index: 1, kind: input, shape index: {}]   ;;  %s764_s2 = inlined_call_operand.hbm [shape: f32[1,1024], index: 2, kind: output, shape index: {}]  }
   0x1   :  { %8 = vsyncpa [#allocation3], 0 }
   0x2   :  { %10 = vsyncpa [#allocation3 + $0x1], 0 }
   0x3   :  { %11 = vsyncpa [#allocation4], 0 }
   0x4   :  { %13 = vsyncpa [#allocation4 + $0x1], 0  ;;  %s556_s9 = smov 0   ;;  %s558_s10 = smov 0  }
   0x5   :  { %s560_s11 = smov 0   ;;  %s562_s12 = smov 0  }
   0x6 LB: > { %s577_s13 = sadd.s32 4294967295, %s535_s12   ;;  %s339_s14 = sadd.s32 4294967294, %s535_s12   ;;  %s535_s12 = sphi %s562_s12, %s785_s12   ;;  %s531_s11 = sphi %s560_s11, %s784_s11   ;;  %s527_s10 = sphi %s558_s10, %s783_s10   ;;  %s523_s9 = sphi %s556_s9, %s782_s9  }
   0x7   : > { %p60_p0 = scmp.ne.s32.totalorder %s527_s10, %s523_s9  ;;  %p765_p1 = scmp.eq.s32.totalorder %s577_s13, 0 }
   0x8   : > { %p90_p3 = scmp.eq.s32.totalorder %s339_s14, 1  ;;  %p340_p5 = scmp.ge.s32.totalorder %s535_s12, 1 }
   0x9   : > { %p586_p4 = por %p765_p1, %p60_p0  ;;  %p97_p7 = scmp.lt.s32.totalorder %s535_s12, 3 }
   0xa   : > { %p591_p6 = por %p90_p3, %p60_p0  ;;  %s602_s18 = sadd.s32 1, %s535_s12  }
   0xb   : > { %s768_s15 = scalar_select %p586_p4, 1, 0 }
   0xc   : > { %s769_s16 = scalar_select %p591_p6, 1, 0 }
   0xd   : > { %p596_p8 = pnand %p340_p5, %p97_p7  ;;  %s44_s19 = ssub.s32 %s535_s12, %s602_s18 }
   0xe   : > { %s47_s20 = sadd.s32 1, %s531_s11  ;;  %p615_p12 = scmp.eq.s32.totalorder %s44_s19, 0 }
   0xf   : > { %p372_p10 = pneg %p596_p8  ;;  %p54_p13 = scmp.ne.s32.totalorder %s531_s11, %s527_s10 }
  0x10   : > { %p55_p0 = scmp.eq.s32.totalorder %s535_s12, 0  ;;  %p385_p3 = scmp.lt.s32.totalorder %s535_s12, 2 }
  0x11   : > { %p611_p11 = pnand %p372_p10, %p765_p1  ;;  %s422_s25 = scalar_lea.hbm %s762_s0, 16 }
  0x12   : > { %p423_p5 = scmp.ne.s32.totalorder %s762_s0, %s422_s25  ;;  %p429_p1 = scmp.lt.u32.totalorder %s422_s25, %s762_s0 }
  0x13   : > { %p424_p7 = pneg %p611_p11 }
  0x15   : > { %p425_p10 = pnand %p424_p7, %p423_p5 }
  0x17   : > { %p426_p9 = pneg %p425_p10 }
  0x19   : > { %p431_p2 = pnand %p429_p1, %p426_p9 }
  0x1b   : > { %434 = shalt.err (!%p431_p2)
}
  0x1c   : > { %s537_s30 = smov [#allocation2]   ;;  %p56_p1 = por %p55_p0, %p54_p13 }
  0x1d   : > { %375 = dma.hbm_to_smem (!%p611_p11), %s762_s0, 16, %s537_s30, [#allocation5]  }
  0x1e   : > { %s642_s5 = scalar_select %p615_p12, %s531_s11, %s47_s20  }
  0x1f   : > { %p773_p2 = scmp.eq.s32.totalorder %s577_s13, 1  ;;  %s119_s7 = sand.u32 1, %s531_s11  }
  0x20   : > { %s362_s8 = sshll.u32 %s535_s12, 8  ;;  %s343_s14 = sshll.u32 %s119_s7, 4 }
  0x21   : > { %p654_p9 = por %p773_p2, %p54_p13  ;;  %s663_s23 = scalar_lea.hbm %s763_s1, %s362_s8 }
  0x22   : > { %s123_s20 = scalar_lea.vmem [#allocation6], %s343_s14  ;;  %p667_p11 = pnand %p385_p3, %p56_p1 }
  0x23   : > { %s774_s6 = scalar_select %p654_p9, 1, 0 }
  0x24   : > { %s131_s22 = sshll.u32 %s123_s20, 4  ;;  %s120_s25 = scalar_lea.sflag [#allocation3], %s119_s7  ;;  %s671_s22 = int_to_ptr.vmem [resolvable:$true] %s131_s22 }
  0x25   : > { %s435_s26 = scalar_lea.hbm %s663_s23, 256  ;;  %p437_p13 = pneg %p667_p11 }
  0x26   : > { %p436_p12 = scmp.ne.s32.totalorder %s663_s23, %s435_s26  ;;  %s440_s29 = scalar_lea.hbm %s763_s1, 512 }
  0x27   : > { %p441_p3 = scmp.lt.u32.totalorder %s663_s23, %s763_s1  ;;  %p442_p7 = scmp.lt.u32.totalorder %s440_s29, %s435_s26 }
  0x28   : > { %p438_p0 = pnand %p437_p13, %p436_p12  ;;  %p444_p1 = scmp.lt.u32.totalorder %s435_s26, %s663_s23 }
  0x29   : > { %p443_p10 = por %p442_p7, %p441_p3 }
  0x2a   : > { %p439_p5 = pneg %p438_p0 }
  0x2b   : > { %p445_p2 = por %p444_p1, %p443_p10 }
  0x2d   : > { %p446_p6 = pnand %p445_p2, %p439_p5 }
  0x2f   : > { %449 = shalt.err (!%p446_p6)
}
  0x30   : > { %s450_s4 = scalar_lea.vmem %s671_s22, 256  ;;  %s538_s7 = smov [#allocation6]  }
  0x31   : > { %p451_p12 = scmp.ne.s32.totalorder %s671_s22, %s450_s4  ;;  %s455_s8 = sshll.u32 %s538_s7, 4  ;;  %s456_s8 = int_to_ptr.vmem [resolvable:$false] %s455_s8 }
  0x32   : > { %s457_s14 = scalar_lea.vmem %s456_s8, 512  ;;  %p458_p4 = scmp.lt.s32.totalorder %s671_s22, %s456_s8 }
  0x33   : > { %p453_p0 = pnand %p451_p12, %p437_p13  ;;  %p459_p3 = scmp.lt.s32.totalorder %s457_s14, %s450_s4 }
  0x35   : > { %p454_p9 = pneg %p453_p0  ;;  %p460_p7 = por %p459_p3, %p458_p4 }
  0x37   : > { %p461_p10 = pnand %p460_p7, %p454_p9 }
  0x39   : > { %464 = shalt.err (!%p461_p10)
}
  0x3a   : > { %379 = dma.hbm_to_vmem [thread:$0]  (!%p667_p11), %s663_s23, 256, %s671_s22, %s120_s25  }
  0x3b   : > { %140 = sbr.rel (%p596_p8) target bundleno = 111 (0x6f), region = 28  ;;  %p776_p6 = scmp.eq.s32.totalorder (!%p596_p8), %s577_s13, 0 }
  0x42   : > { %510 = dma.done.wait (%p776_p6), [#allocation5], 16   ;;  %p777_p13 = pmov %p776_p6 }
  0x43   : > { %s705_s19 = sand.u32 1, %s527_s10   ;;  %p778_p4 = scmp.ne.s32.totalorder %s768_s15, 0 }
  0x44   : > { %512 = vsyncadd (%p777_p13), [#allocation5], 4294967280  ;;  %s348_s21 = sshll.u32 %s705_s19, 4  ;;  %s147_s20 = scalar_lea.sflag [#allocation3], %s705_s19 }
  0x45   : > { %s150_s24 = scalar_lea.vmem [#allocation6], %s348_s21 }
  0x46   : > { %514 = dma.done.wait (%p778_p4), %s147_s20, 256  }
  0x47   : > { %516 = vsyncadd (%p778_p4), %s147_s20, 4294967040 }
  0x48   : > { %155 = sfence }
  0x49   : > { %s176_s17 = sld [smem:[#allocation2]]  ;;  %s350_s23 = sld [smem:[#allocation2 + $0x1]]  ;;  %v174_v0 = vld [vmem:[%s150_s24] sm:$0x77]  ;;  %v175_v1 = vld [vmem:[%s150_s24 + $0x8] sm:$0x77]  ;;  %v217_v4 = vlaneseq }
  0x4a   : > { %s353_s22 = sld [smem:[#allocation2 + $0x2]]  ;;  %s356_s25 = sld [smem:[#allocation2 + $0x3]]  ;;  %v539_v2 = vmov 1966171168  }
  0x4b   : > { %v215_v3 = vunpack.c.l.s4 %v539_v2  ;;  %v218_v15 = vshrl.u32 %v217_v4, 7  ;;  %s349_s15 = sshll.u32 %s705_s19, 2  ;;  %s363_s28 = sshll.u32 %s577_s13, 6  ;;  %vm239_vm0 = vcmp.lt.s32.totalorder %v217_v4, 512 }
  0x4c   : > { %s171_s26 = scalar_lea.vmem [#allocation7], %s349_s15  ;;  %s720_s3 = scalar_lea.hbm %s764_s2, %s363_s28 }
  0x4d   : > { %v216_v14 = vunpack.c.0.s8 %v215_v3  ;;  %s257_s27 = sshll.u32 %s171_s26, 4  ;;  %s243_s4 = scalar_lea.sflag [#allocation4], %s705_s19  ;;  %s715_s27 = int_to_ptr.vmem [resolvable:$true] %s257_s27 }
  0x4e   : > { %s465_s7 = scalar_lea.vmem %s715_s27, 64  ;;  %p779_p9 = scmp.ne.s32.totalorder %s774_s6, 0 }
  0x4f   : > { %v177_v5 = vstv %s176_s17  ;;  %v181_v8 = vstv %s350_s23  ;;  %v219_v25 = vsub.s32 %v216_v14, %v218_v15  ;;  %p466_p8 = scmp.ne.s32.totalorder %s715_s27, %s465_s7  ;;  %s540_s13 = smov [#allocation7]  }
  0x50   : > { %v178_v6 = vmul.f32 %v177_v5, %v174_v0  ;;  %v179_v7 = vmul.f32 %v177_v5, %v175_v1  ;;  %v195_v9 = vstv %s353_s22  ;;  %v182_v10 = vmul.f32 %v181_v8, %v174_v0  ;;  %s469_s8 = sshll.u32 %s540_s13, 4  ;;  %s470_s8 = int_to_ptr.vmem [resolvable:$false] %s469_s8 }
  0x51   : > { %v183_v11 = vmul.f32 %v181_v8, %v175_v1  ;;  %v196_v12 = vmul.f32 %v195_v9, %v174_v0  ;;  %v197_v13 = vmul.f32 %v195_v9, %v175_v1  ;;  %v209_v22 = vstv %s356_s25  ;;  %p467_p11 = pnand %p466_p8, %p779_p9  ;;  %s471_s14 = scalar_lea.vmem %s470_s8, 128 }
  0x52   : > { %v351_v16 = vrot.slane %v182_v10, 9  ;;  %p472_p1 = scmp.lt.s32.totalorder %s715_s27, %s470_s8  ;;  %p473_p2 = scmp.lt.s32.totalorder %s471_s14, %s465_s7 }
  0x53   : > { %v352_v17 = vrot.slane %v183_v11, 9  ;;  %v354_v18 = vrot.slane %v196_v12, 10  ;;  %v355_v19 = vrot.slane %v197_v13, 10  ;;  %p468_p5 = pneg %p467_p11 }
  0x54   : > { %v192_v20 = vadd.f32 %v351_v16, %v178_v6  ;;  %p474_p12 = por %p473_p2, %p472_p1 }
  0x55   : > { %v193_v21 = vadd.f32 %v352_v17, %v179_v7 }
  0x56   : > { %v206_v23 = vadd.f32 %v354_v18, %v192_v20  ;;  %p475_p0 = pnand %p474_p12, %p468_p5 }
  0x57   : > { %v207_v24 = vadd.f32 %v355_v19, %v193_v21 }
  0x58   : > { %v210_v26 = vadd.f32 %v209_v22, %v206_v23 }
  0x59   : > { %v211_v27 = vadd.f32 %v209_v22, %v207_v24 }
  0x5a   : > { %v220_v28 = vrot.slane %v210_v26, %v219_v25 }
  0x5b   : > { %v227_v29 = vrot.slane %v211_v27, %v219_v25 }
  0x5d   : > { %v228_v30 = vcombine.low %v220_v28, %v227_v29 }
  0x5f   : > { %v235_v31 = vrot.slane %v228_v30, %v219_v25 }
  0x61   : > { %241 = vst.msk [vmem:[%s171_s26] sm:$0xf] %vm239_vm0, %v235_v31 }
  0x62   : > { %478 = shalt.err (!%p475_p0)
}
  0x63   : > { %s479_s19 = scalar_lea.hbm %s720_s3, 64  ;;  %s483_s24 = scalar_lea.hbm %s764_s2, 128 }
  0x64   : > { %p480_p3 = scmp.ne.s32.totalorder %s720_s3, %s479_s19  ;;  %p484_p6 = scmp.lt.u32.totalorder %s720_s3, %s764_s2 }
  0x65   : > { %p485_p13 = scmp.lt.u32.totalorder %s483_s24, %s479_s19  ;;  %p487_p8 = scmp.lt.u32.totalorder %s479_s19, %s720_s3 }
  0x66   : > { %p481_p7 = pnand %p480_p3, %p779_p9 }
  0x67   : > { %p486_p4 = por %p485_p13, %p484_p6 }
  0x68   : > { %p482_p10 = pneg %p481_p7 }
  0x69   : > { %p488_p11 = por %p487_p8, %p486_p4 }
  0x6b   : > { %p489_p5 = pnand %p488_p11, %p482_p10 }
  0x6d   : > { %492 = shalt.err (!%p489_p5)
}
  0x6e   : > { %370 = dma.vmem_to_hbm [thread:$0]  (%p779_p9), %s715_s27, 64, %s720_s3, %s243_s4  }
  0x6f PF: > { %s269_s22 = sand.u32 1, %s523_s9   ;;  %p780_p1 = scmp.ne.s32.totalorder %s769_s16, 0 }
  0x70   : > { %p781_p2 = scmp.ge.s32.totalorder %s535_s12, 2  ;;  %s270_s25 = scalar_lea.sflag [#allocation4], %s269_s22 }
  0x72   : > { %p381_p12 = pnand %p781_p2, %p780_p1 }
  0x74   : > { %518 = dma.done.wait (!%p381_p12), %s270_s25, 64  }
  0x75   : > { %520 = vsyncadd (!%p381_p12), %s270_s25, 4294967232  ;;  %p16_p0 = scmp.ge.s32.totalorder %s602_s18, 4   ;;  %s782_s9 = smov %s527_s10 }
  0x76   : > { %s783_s10 = smov %s531_s11  ;;  %s784_s11 = smov %s642_s5 }
  0x77   : > { %s785_s12 = smov %s602_s18  ;;  %18 = sbr.rel (!%p16_p0) target bundleno = 6 (0x6), region = 78 }
  0x7e   :  { %275 = vsyncpa [#allocation3], 1 }
  0x7f   :  { %277 = vsyncpa [#allocation3 + $0x1], 1 }
  0x80   :  { %278 = vsyncpa [#allocation4], 1 }
  0x81   :  { %280 = vsyncpa [#allocation4 + $0x1], 1 }
  0x82   :  { %281 = vsyncpa [#allocation5], 1 }
  0x83   :  { %283 = vsyncpa [#allocation5 + $0x1], 1 }

</bundles_post_ra>
